<compile_context>
chip_gen: v5e
topology: v5e:2x2
jax: 0.10.0
libtpu: 0.0.40
codegen_flags: <defaults>
</compile_context>

<pallas_src>
import functools

import jax
import jax.numpy as jnp
from jax.experimental import pallas as pl
from jax.experimental.pallas import tpu as pltpu

EPS = 1e-5
NEG_BIG = -1e30  # padded-action logit bias (exp underflows to 0)


# ---------------------------------------------------------------------------
# Kernel
# ---------------------------------------------------------------------------
def actor_kernel(obs_ref, aff0_ref,
                 w1_ref, b1_ref, w2_ref, b2_ref,
                 w3_ref, b3_ref, w4_ref, b4_ref,
                 out_ref):
    # input BN (folded) + stage embedding: single affine scale/shift on obs
    x = obs_ref[...] * aff0_ref[0:1, :] + aff0_ref[1:2, :]

    def linear(h, w_ref, b_ref, relu):
        # bf16 operands into the MXU, f32 accumulation; bias/BN already folded.
        z = jnp.dot(h.astype(jnp.bfloat16), w_ref[...],
                    preferred_element_type=jnp.float32)
        z = z + b_ref[...]
        return jnp.maximum(z, 0.0) if relu else z

    h = linear(x, w1_ref, b1_ref, True)          # layer1 (stage-sliced, BN folded)
    h = linear(h, w2_ref, b2_ref, True)          # layer2
    h = linear(h, w3_ref, b3_ref, True)          # layer3
    logits = linear(h, w4_ref, b4_ref, False)    # last_layer (padded cols -> -1e30)

    # softmax over the (padded) action dim; padded lanes contribute exp()=0
    m = jnp.max(logits, axis=-1, keepdims=True)
    e = jnp.exp(logits - m)
    out_ref[...] = e * pl.reciprocal(jnp.sum(e, axis=-1, keepdims=True),
                                     approx=True)


# ---------------------------------------------------------------------------
# Wrapper: stage-dependent slicing + BN folding (done once per stage, outside
# the per-call hot path), then a gridless fused pallas_call.
# ---------------------------------------------------------------------------
def fold_params(params, stage, n_state):
    """Fold BN into linear weights, slice slimmable params, pad last layer."""
    # --- input BN + stage embedding -> affine (scale, shift) on obs ---------
    bn0 = params["input_norm"][stage]
    s0 = bn0["gamma"] * jax.lax.rsqrt(bn0["var"] + EPS)
    t0 = bn0["beta"] - bn0["mean"] * s0 + params["embedding"][stage, :n_state]
    aff0 = jnp.stack([s0, t0]).astype(jnp.float32)            # (2, n_state)

    # --- Linear + BN -> Linear with folded weight / bias ---------------------
    def fold_linear_bn(w, b, bn):
        s = bn["gamma"] * jax.lax.rsqrt(bn["var"] + EPS)       # per-output col
        w_f = (w * s[None, :]).astype(jnp.bfloat16)
        b_f = ((b - bn["mean"]) * s + bn["beta"]).reshape(1, -1).astype(jnp.float32)
        return w_f, b_f

    w1, b1 = fold_linear_bn(params["w1"][:n_state, :], params["b1"], params["bn1"])
    w2, b2 = fold_linear_bn(params["w2"], params["b2"], params["bn2"])
    w3, b3 = fold_linear_bn(params["w3"], params["b3"], params["bn3"])

    # --- last layer: pad action dim to a multiple of 128 (lane-dense store) --
    na = params["w4"].shape[1]
    na_pad = ((na + 127) // 128) * 128
    w4 = jnp.pad(params["w4"], ((0, 0), (0, na_pad - na))).astype(jnp.bfloat16)
    b4 = jnp.pad(params["b4"], (0, na_pad - na),
                 constant_values=NEG_BIG).reshape(1, -1).astype(jnp.float32)

    folded = {"aff0": aff0, "w1": w1, "b1": b1, "w2": w2, "b2": b2,
              "w3": w3, "b3": b3, "w4": w4, "b4": b4}
    return folded, na


def actor_forward(obs, fp, *, num_actions):
    b, _ = obs.shape
    b_pad = ((b + 7) // 8) * 8                     # full f32 sublane tile
    obs_p = jnp.pad(obs.astype(jnp.float32), ((0, b_pad - b), (0, 0)))
    na_pad = fp["w4"].shape[1]

    inputs = [obs_p, fp["aff0"],
              fp["w1"], fp["b1"], fp["w2"], fp["b2"],
              fp["w3"], fp["b3"], fp["w4"], fp["b4"]]

    vmem = pl.BlockSpec(memory_space=pltpu.MemorySpace.VMEM)
    out = pl.pallas_call(
        actor_kernel,
        in_specs=[vmem] * len(inputs),
        out_specs=vmem,
        out_shape=jax.ShapeDtypeStruct((b_pad, na_pad), jnp.float32),
    )(*inputs)
    return out[:b, :num_actions]


# ---------------------------------------------------------------------------
# Pure-JAX reference (f32) for correctness check
# ---------------------------------------------------------------------------
def actor_reference(obs, params, stage):
    _, n_state = obs.shape
    bn0 = params["input_norm"][stage]
    x = (obs - bn0["mean"]) * jax.lax.rsqrt(bn0["var"] + EPS) * bn0["gamma"] + bn0["beta"]
    x = x + params["embedding"][stage, :n_state][None, :]

    def block(h, w, b, bn):
        z = h @ w + b
        z = (z - bn["mean"]) * jax.lax.rsqrt(bn["var"] + EPS) * bn["gamma"] + bn["beta"]
        return jnp.maximum(z, 0.0)

    h = block(x, params["w1"][:n_state, :], params["b1"], params["bn1"])
    h = block(h, params["w2"], params["b2"], params["bn2"])
    h = block(h, params["w3"], params["b3"], params["bn3"])
    logits = h @ params["w4"] + params["b4"]
    return jax.nn.softmax(logits, axis=-1)


# ---------------------------------------------------------------------------
# Deterministic synthetic init mirroring DQN.__init__ shapes
# ---------------------------------------------------------------------------
def init_params(key, num_state, num_actions=100, num_feat=64):
    ks = iter(jax.random.split(key, 64))

    def kaiming_uniform(k, fan_in, fan_out):
        bound = jnp.sqrt(6.0 / fan_in)           # kaiming_uniform, mode='fan_in'
        return jax.random.uniform(k, (fan_in, fan_out), jnp.float32,
                                  minval=-bound, maxval=bound)

    def linear_bias(k, fan_in, fan_out):
        bound = 1.0 / jnp.sqrt(float(fan_in))
        return jax.random.uniform(k, (fan_out,), jnp.float32,
                                  minval=-bound, maxval=bound)

    def bn(k, n):
        k1, k2, k3, k4 = jax.random.split(k, 4)
        return {
            "gamma": jax.random.uniform(k1, (n,), jnp.float32, 0.5, 1.5),
            "beta": jax.random.normal(k2, (n,), jnp.float32) * 0.1,
            "mean": jax.random.normal(k3, (n,), jnp.float32) * 0.1,
            "var": jax.random.uniform(k4, (n,), jnp.float32, 0.5, 1.5),
        }

    max_state = max(num_state)
    params = {
        "embedding": jax.random.normal(next(ks), (2, max_state), jnp.float32),
        "input_norm": [bn(next(ks), n) for n in num_state],
        "w1": kaiming_uniform(next(ks), max_state, num_feat),
        "b1": linear_bias(next(ks), max_state, num_feat),
        "bn1": bn(next(ks), num_feat),
        "w2": kaiming_uniform(next(ks), num_feat, 2 * num_feat),
        "b2": linear_bias(next(ks), num_feat, 2 * num_feat),
        "bn2": bn(next(ks), 2 * num_feat),
        "w3": kaiming_uniform(next(ks), 2 * num_feat, 4 * num_feat),
        "b3": linear_bias(next(ks), 2 * num_feat, 4 * num_feat),
        "bn3": bn(next(ks), 4 * num_feat),
        "w4": kaiming_uniform(next(ks), 4 * num_feat, num_actions),
        "b4": linear_bias(next(ks), 4 * num_feat, num_actions),
    }
    return params


if __name__ == "__main__":
    key = jax.random.PRNGKey(0)
    k_param, k_obs = jax.random.split(key)

    num_state = [16, 32]          # slimmable widths (per stage)
    num_actions = 100
    stage = 1                     # active stage -> obs has num_state[1] features
    batch = 4

    params = init_params(k_param, num_state, num_actions=num_actions)
    obs = jax.random.normal(k_obs, (batch, num_state[stage]), jnp.float32)

    # Stage-dependent slicing + BN folding: once, outside the per-call path.
    folded, na = fold_params(params, stage, num_state[stage])

    fwd = jax.jit(functools.partial(actor_forward, num_actions=na))
    out = fwd(obs, folded)
    jax.block_until_ready(out)

    assert out.shape == (batch, num_actions)
    # softmax output: rows sum to 1 (approx reciprocal + bf16 weights -> loose tol)
    assert jnp.allclose(jnp.sum(out, axis=-1), 1.0, atol=5e-3)
    # match the f32 pure-JAX reference (bf16 weight tolerance)
    ref = actor_reference(obs, params, stage)
    assert jnp.max(jnp.abs(out - ref)) < 2e-2

    print("KERNEL_OK")
</pallas_src>

<mosaic_0001>
module attributes {stable_mosaic.version = 11 : i64} {
  func.func @actor_kernel(%arg0: memref<8x32xf32, #tpu.memory_space<vmem>>, %arg1: memref<2x32xf32, #tpu.memory_space<vmem>>, %arg2: memref<32x64xbf16, #tpu.memory_space<vmem>>, %arg3: memref<1x64xf32, #tpu.memory_space<vmem>>, %arg4: memref<64x128xbf16, #tpu.memory_space<vmem>>, %arg5: memref<1x128xf32, #tpu.memory_space<vmem>>, %arg6: memref<128x256xbf16, #tpu.memory_space<vmem>>, %arg7: memref<1x256xf32, #tpu.memory_space<vmem>>, %arg8: memref<256x128xbf16, #tpu.memory_space<vmem>>, %arg9: memref<1x128xf32, #tpu.memory_space<vmem>>, %arg10: memref<8x128xf32, #tpu.memory_space<vmem>>) attributes {dimension_semantics = [], scalar_prefetch = 0 : i64, scratch_operands = 0 : i64, tpu.core_type = #tpu.core_type<tc>} {
    %c0 = arith.constant 0 : index
    %c0_0 = arith.constant 0 : index
    %0 = vector.load %arg0[%c0, %c0_0] : memref<8x32xf32, #tpu.memory_space<vmem>>, vector<8x32xf32>
    %c0_1 = arith.constant 0 : index
    %c0_2 = arith.constant 0 : index
    %1 = vector.load %arg1[%c0_1, %c0_2] : memref<2x32xf32, #tpu.memory_space<vmem>>, vector<1x32xf32>
    %2 = vector.broadcast %1 : vector<1x32xf32> to vector<8x32xf32>
    %3 = arith.mulf %0, %2 : vector<8x32xf32>
    %c1 = arith.constant 1 : index
    %c0_3 = arith.constant 0 : index
    %4 = vector.load %arg1[%c1, %c0_3] : memref<2x32xf32, #tpu.memory_space<vmem>>, vector<1x32xf32>
    %5 = vector.broadcast %4 : vector<1x32xf32> to vector<8x32xf32>
    %6 = arith.addf %3, %5 : vector<8x32xf32>
    %7 = arith.truncf %6 : vector<8x32xf32> to vector<8x32xbf16>
    %c0_4 = arith.constant 0 : index
    %c0_5 = arith.constant 0 : index
    %8 = vector.load %arg2[%c0_4, %c0_5] : memref<32x64xbf16, #tpu.memory_space<vmem>>, vector<32x64xbf16>
    %cst = arith.constant dense<0.000000e+00> : vector<8x64xf32>
    %9 = tpu.matmul %7, %8, %cst {dimension_numbers = #tpu.dot_dimension_numbers<[1], [0], [0], [1], [0, 0, 1, 1], [], []>} : vector<8x32xbf16>, vector<32x64xbf16>, vector<8x64xf32> -> vector<8x64xf32>
    %c0_6 = arith.constant 0 : index
    %c0_7 = arith.constant 0 : index
    %10 = vector.load %arg3[%c0_6, %c0_7] : memref<1x64xf32, #tpu.memory_space<vmem>>, vector<1x64xf32>
    %11 = vector.broadcast %10 : vector<1x64xf32> to vector<8x64xf32>
    %12 = arith.addf %9, %11 : vector<8x64xf32>
    %cst_8 = arith.constant 0.000000e+00 : f32
    %13 = vector.broadcast %cst_8 : f32 to vector<8x64xf32>
    %14 = arith.maximumf %12, %13 : vector<8x64xf32>
    %15 = arith.truncf %14 : vector<8x64xf32> to vector<8x64xbf16>
    %c0_9 = arith.constant 0 : index
    %c0_10 = arith.constant 0 : index
    %16 = vector.load %arg4[%c0_9, %c0_10] : memref<64x128xbf16, #tpu.memory_space<vmem>>, vector<64x128xbf16>
    %cst_11 = arith.constant dense<0.000000e+00> : vector<8x128xf32>
    %17 = tpu.matmul %15, %16, %cst_11 {dimension_numbers = #tpu.dot_dimension_numbers<[1], [0], [0], [1], [0, 0, 1, 1], [], []>} : vector<8x64xbf16>, vector<64x128xbf16>, vector<8x128xf32> -> vector<8x128xf32>
    %c0_12 = arith.constant 0 : index
    %c0_13 = arith.constant 0 : index
    %18 = vector.load %arg5[%c0_12, %c0_13] : memref<1x128xf32, #tpu.memory_space<vmem>>, vector<1x128xf32>
    %19 = vector.broadcast %18 : vector<1x128xf32> to vector<8x128xf32>
    %20 = arith.addf %17, %19 : vector<8x128xf32>
    %cst_14 = arith.constant 0.000000e+00 : f32
    %21 = vector.broadcast %cst_14 : f32 to vector<8x128xf32>
    %22 = arith.maximumf %20, %21 : vector<8x128xf32>
    %23 = arith.truncf %22 : vector<8x128xf32> to vector<8x128xbf16>
    %c0_15 = arith.constant 0 : index
    %c0_16 = arith.constant 0 : index
    %24 = vector.load %arg6[%c0_15, %c0_16] : memref<128x256xbf16, #tpu.memory_space<vmem>>, vector<128x256xbf16>
    %cst_17 = arith.constant dense<0.000000e+00> : vector<8x256xf32>
    %25 = tpu.matmul %23, %24, %cst_17 {dimension_numbers = #tpu.dot_dimension_numbers<[1], [0], [0], [1], [0, 0, 1, 1], [], []>} : vector<8x128xbf16>, vector<128x256xbf16>, vector<8x256xf32> -> vector<8x256xf32>
    %c0_18 = arith.constant 0 : index
    %c0_19 = arith.constant 0 : index
    %26 = vector.load %arg7[%c0_18, %c0_19] : memref<1x256xf32, #tpu.memory_space<vmem>>, vector<1x256xf32>
    %27 = vector.broadcast %26 : vector<1x256xf32> to vector<8x256xf32>
    %28 = arith.addf %25, %27 : vector<8x256xf32>
    %cst_20 = arith.constant 0.000000e+00 : f32
    %29 = vector.broadcast %cst_20 : f32 to vector<8x256xf32>
    %30 = arith.maximumf %28, %29 : vector<8x256xf32>
    %31 = arith.truncf %30 : vector<8x256xf32> to vector<8x256xbf16>
    %c0_21 = arith.constant 0 : index
    %c0_22 = arith.constant 0 : index
    %32 = vector.load %arg8[%c0_21, %c0_22] : memref<256x128xbf16, #tpu.memory_space<vmem>>, vector<256x128xbf16>
    %cst_23 = arith.constant dense<0.000000e+00> : vector<8x128xf32>
    %33 = tpu.matmul %31, %32, %cst_23 {dimension_numbers = #tpu.dot_dimension_numbers<[1], [0], [0], [1], [0, 0, 1, 1], [], []>} : vector<8x256xbf16>, vector<256x128xbf16>, vector<8x128xf32> -> vector<8x128xf32>
    %c0_24 = arith.constant 0 : index
    %c0_25 = arith.constant 0 : index
    %34 = vector.load %arg9[%c0_24, %c0_25] : memref<1x128xf32, #tpu.memory_space<vmem>>, vector<1x128xf32>
    %35 = vector.broadcast %34 : vector<1x128xf32> to vector<8x128xf32>
    %36 = arith.addf %33, %35 : vector<8x128xf32>
    %cst_26 = arith.constant dense<0xFF800000> : vector<8xf32>
    %37 = vector.multi_reduction <maximumf>, %36, %cst_26 [1] : vector<8x128xf32> to vector<8xf32>
    %38 = vector.shape_cast %37 : vector<8xf32> to vector<8x1xf32>
    %39 = vector.broadcast %38 : vector<8x1xf32> to vector<8x128xf32>
    %40 = arith.subf %36, %39 : vector<8x128xf32>
    %41 = math.exp %40 : vector<8x128xf32>
    %cst_27 = arith.constant dense<0.000000e+00> : vector<8xf32>
    %42 = vector.multi_reduction <add>, %41, %cst_27 [1] : vector<8x128xf32> to vector<8xf32>
    %43 = vector.shape_cast %42 : vector<8xf32> to vector<8x1xf32>
    %44 = tpu.reciprocal %43 {approx = true} : vector<8x1xf32> -> vector<8x1xf32>
    %45 = vector.broadcast %44 : vector<8x1xf32> to vector<8x128xf32>
    %46 = arith.mulf %41, %45 : vector<8x128xf32>
    %c0_28 = arith.constant 0 : index
    %c0_29 = arith.constant 0 : index
    %47 = vector.load %arg10[%c0_28, %c0_29] : memref<8x128xf32, #tpu.memory_space<vmem>>, vector<8x128xf32>
    tpu.vector_store %arg10[%c0_28, %c0_29], %46 {strides = array<i32>} : memref<8x128xf32, #tpu.memory_space<vmem>>, vector<8x128xf32>,
    return
  }
}

</mosaic_0001>

<bundles_post_ra>
// kernel: actor_forward.1
= control target key start
LH: loop header
LB: loop body
LE: loop exit
PB: predicated region body
PF: predicated region fallthrough
CT: control target
= control target key end

     0   :  { %15 = vsyncpa [#allocation3], 0  ;;  %s1040_s0 = inlined_call_operand.vmem [shape: f32[8,32], index: 0, kind: input, shape index: {}]   ;;  %s1041_s1 = inlined_call_operand.vmem [shape: f32[2,32], index: 1, kind: input, shape index: {}]   ;;  %s1042_s2 = inlined_call_operand.vmem [shape: bf16[32,64], index: 2, kind: input, shape index: {}]   ;;  %s1043_s3 = inlined_call_operand.hbm [shape: f32[1,64], index: 3, kind: input, shape index: {}]   ;;  %s1044_s4 = inlined_call_operand.hbm [shape: bf16[64,128], index: 4, kind: input, shape index: {}]   ;;  %s1045_s5 = inlined_call_operand.hbm [shape: f32[1,128], index: 5, kind: input, shape index: {}]   ;;  %s1046_s6 = inlined_call_operand.hbm [shape: bf16[128,256], index: 6, kind: input, shape index: {}]   ;;  %s1047_s7 = inlined_call_operand.hbm [shape: f32[1,256], index: 7, kind: input, shape index: {}]   ;;  %s1048_s8 = inlined_call_operand.hbm [shape: bf16[256,128], index: 8, kind: input, shape index: {}]   ;;  %s1049_s9 = inlined_call_operand.hbm [shape: f32[1,128], index: 9, kind: input, shape index: {}]   ;;  %s1050_s10 = inlined_call_operand.vmem [shape: f32[8,128], index: 10, kind: output, shape index: {}]  }
   0x1   :  { %16 = vsyncpa [#allocation5], 0 }
   0x2   :  { %17 = vsyncpa [#allocation8], 0  ;;  %s40_s15 = sshll.u32 %s1044_s4, 4  ;;  %s41_s15 = int_to_ptr.hbm [resolvable:$true] %s40_s15 }
   0x3   :  { %18 = vsyncpa [#allocation11], 0  ;;  %s935_s16 = smov [#allocation4]   ;;  %s64_s20 = sshll.u32 %s1046_s6, 4  ;;  %s65_s20 = int_to_ptr.hbm [resolvable:$true] %s64_s20 }
   0x4   :  { %s42_s17 = sshll.u32 %s935_s16, 4  ;;  %s936_s21 = smov 64   ;;  %s43_s17 = int_to_ptr.vmem [resolvable:$true] %s42_s17 }
   0x5   :  { %s937_s22 = smov 4   ;;  %s938_s23 = smov [#allocation7]  }
   0x6   :  { %48 = dma.hbm_to_vmem [thread:$0]  %s41_s15, 512, %s43_s17, [#allocation5], %s936_s21, %s936_s21, %s937_s22  }
   0x7   :  { %s66_s24 = sshll.u32 %s938_s23, 4  ;;  %s939_s25 = smov 128   ;;  %s67_s24 = int_to_ptr.vmem [resolvable:$true] %s66_s24 }
   0x8   :  { %s940_s26 = smov 8   ;;  %s88_s28 = sshll.u32 %s1048_s8, 4  ;;  %s89_s28 = int_to_ptr.hbm [resolvable:$true] %s88_s28 }
   0x9   :  { %72 = dma.hbm_to_vmem [thread:$0]  %s65_s20, 2048, %s67_s24, [#allocation8], %s939_s25, %s939_s25, %s940_s26  }
   0xa   :  { %s941_s29 = smov [#allocation10]   ;;  %s30_s12 = sshll.u32 %s1043_s3, 4  ;;  %s31_s12 = int_to_ptr.hbm [resolvable:$true] %s30_s12 }
   0xb   :  { %s90_s30 = sshll.u32 %s941_s29, 4  ;;  %s942_s13 = smov [#allocation2]   ;;  %s91_s30 = int_to_ptr.vmem [resolvable:$true] %s90_s30 }
   0xc   :  { %96 = dma.hbm_to_vmem [thread:$0]  %s89_s28, 2048, %s91_s30, [#allocation11], %s936_s21, %s936_s21, %s937_s22  }
   0xd   :  { %s32_s14 = sshll.u32 %s942_s13, 4  ;;  %s54_s17 = sshll.u32 %s1045_s5, 4  ;;  %s33_s14 = int_to_ptr.vmem [resolvable:$true] %s32_s14  ;;  %s55_s17 = int_to_ptr.hbm [resolvable:$true] %s54_s17 }
   0xe   :  { %35 = dma.hbm_to_vmem [thread:$0]  %s31_s12, 16, %s33_s14, [#allocation3]  }
   0xf   :  { %s78_s19 = sshll.u32 %s1047_s7, 4  ;;  %s943_s20 = smov [#allocation6]   ;;  %s79_s19 = int_to_ptr.hbm [resolvable:$true] %s78_s19 }
  0x10   :  { %s56_s23 = sshll.u32 %s943_s20, 4  ;;  %s944_s3 = smov [#allocation9]   ;;  %s57_s23 = int_to_ptr.vmem [resolvable:$true] %s56_s23 }
  0x11   :  { %59 = dma.hbm_to_vmem [thread:$0]  %s55_s17, 16, %s57_s23, [#allocation5]  }
  0x12   :  { %s80_s21 = sshll.u32 %s944_s3, 4  ;;  %s102_s25 = sshll.u32 %s1049_s9, 4  ;;  %s81_s21 = int_to_ptr.vmem [resolvable:$true] %s80_s21  ;;  %s103_s25 = int_to_ptr.hbm [resolvable:$true] %s102_s25 }
  0x13   :  { %83 = dma.hbm_to_vmem [thread:$0]  %s79_s19, 32, %s81_s21, [#allocation8]  }
  0x14   :  { %s945_s5 = smov [#allocation12]  }
  0x15   :  { %s104_s26 = sshll.u32 %s945_s5, 4  ;;  %s105_s26 = int_to_ptr.vmem [resolvable:$true] %s104_s26 }
  0x16   :  { %107 = dma.hbm_to_vmem [thread:$0]  %s103_s25, 16, %s105_s26, [#allocation11]  }
  0x17   :  { %927 = dma.done.wait [#allocation3], 16  }
  0x18   :  { %928 = vsyncadd [#allocation3], 4294967280 }
  0x19   :  { %929 = dma.done.wait [#allocation5], 528  }
  0x1a   :  { %930 = vsyncadd [#allocation5], 4294966768 }
  0x1b   :  { %931 = dma.done.wait [#allocation8], 2080  }
  0x1c   :  { %932 = vsyncadd [#allocation8], 4294965216 }
  0x1d   :  { %933 = dma.done.wait [#allocation11], 2064  }
  0x1e   :  { %934 = vsyncadd [#allocation11], 4294965232  ;;  %v702_v0 = vld [vmem:[%s1042_s2 + $0x8] sm:$0xff]  ;;  %v137_v1 = vld [vmem:[%s1040_s0] sm:$0xff]  ;;  %vm165_vm0 = vcmask 261120   ;;  %vm220_vm1 = vcmask 523264  }
  0x1f   :  { %v750_v2 = vld [vmem:[%s1041_s1] ss:$0 sm:$0xff]  ;;  %175 = vmatpush.bf16.msra.mxu0 %v702_v0  ;;  %v751_v4 = vld [vmem:[%s1041_s1 + $0x1] ss:$0 sm:$0xff]  ;;  %v705_v7 = vld [vmem:[#allocation4 + $0x10] sm:$0xff] }
  0x20   :  { %v701_v3 = vld [vmem:[%s1042_s2] sm:$0xff]  ;;  %v140_v6 = vmul.f32 %v750_v2, %v137_v1  ;;  %v704_v10 = vld [vmem:[#allocation4 + $0x8] sm:$0xff]  ;;  %v631_v12 = vld [vmem:[#allocation7 + $0x70] sm:$0xf] }
  0x21   :  { %v706_v5 = vld [vmem:[#allocation4 + $0x18] sm:$0xff]  ;;  %v703_v11 = vld [vmem:[#allocation4] sm:$0xff]  ;;  %v720_v18 = vld [vmem:[#allocation7 + $0x64] sm:$0xf0] }
  0x22   :  { %228 = vmatpush.bf16.msra.mxu1 %v706_v5  ;;  %v143_v8 = vadd.f32 %v751_v4, %v140_v6  ;;  %v722_v13 = vld [vmem:[#allocation7 + $0x74] sm:$0xf0]  ;;  %v721_v14 = vld [vmem:[#allocation7 + $0x74] sm:$0xf]  ;;  %v633_v16 = vld [vmem:[#allocation7 + $0x78] sm:$0xf0] }
  0x23   :  { %176 = vmatpush.bf16.msra.mxu0 %v701_v3  ;;  %v632_v15 = vor.u32 %v722_v13, %v631_v12  ;;  %v623_v17 = vld [vmem:[#allocation7 + $0x60] sm:$0xf]  ;;  %v636_v19 = vor.u32 %v721_v14, %v633_v16  ;;  %v719_v20 = vld [vmem:[#allocation7 + $0x64] sm:$0xf]  ;;  %v625_v21 = vld [vmem:[#allocation7 + $0x68] sm:$0xf0] }
  0x24   :  { %v144_v9 = vpack.c.bf16 %v143_v8, %v143_v8  ;;  %v624_v22 = vor.u32 %v720_v18, %v623_v17  ;;  %v628_v23 = vor.u32 %v719_v20, %v625_v21  ;;  %v615_v24 = vld [vmem:[#allocation7 + $0x50] sm:$0xf]  ;;  %v718_v25 = vld [vmem:[#allocation7 + $0x54] sm:$0xf0]  ;;  %v717_v26 = vld [vmem:[#allocation7 + $0x54] sm:$0xf] }
  0x25   :  { %341 = vmatpush.bf16.msra.mxu2 %v632_v15  ;;  %354 = vmatpush.bf16.msra.mxu3 %v636_v19  ;;  %v617_v27 = vld [vmem:[#allocation7 + $0x58] sm:$0xf0]  ;;  %v616_v28 = vor.u32 %v718_v25, %v615_v24  ;;  %v607_v30 = vld [vmem:[#allocation7 + $0x40] sm:$0xf]  ;;  %v716_v31 = vld [vmem:[#allocation7 + $0x44] sm:$0xf0] }
  0x26   :  { %229 = vmatpush.bf16.msra.mxu1 %v705_v7  ;;  %555 = vmatmul.msk.bf16.vlgmr.msra.gmra.mxu0 %vm165_vm0, %v144_v9  ;;  %v620_v29 = vor.u32 %v717_v26, %v617_v27  ;;  %v715_v32 = vld [vmem:[#allocation7 + $0x44] sm:$0xf]  ;;  %v609_v33 = vld [vmem:[#allocation7 + $0x48] sm:$0xf0]  ;;  %v608_v34 = vor.u32 %v716_v31, %v607_v30  ;;  %v599_v36 = vld [vmem:[#allocation7 + $0x30] sm:$0xf] }
  0x27   :  { %v612_v35 = vor.u32 %v715_v32, %v609_v33  ;;  %v714_v37 = vld [vmem:[#allocation7 + $0x34] sm:$0xf0]  ;;  %v713_v38 = vld [vmem:[#allocation7 + $0x34] sm:$0xf]  ;;  %v601_v39 = vld [vmem:[#allocation7 + $0x38] sm:$0xf0] }
  0x28   :  { %v600_v40 = vor.u32 %v714_v37, %v599_v36  ;;  %v604_v41 = vor.u32 %v713_v38, %v601_v39  ;;  %v591_v42 = vld [vmem:[#allocation7 + $0x20] sm:$0xf]  ;;  %v712_v43 = vld [vmem:[#allocation7 + $0x24] sm:$0xf0]  ;;  %v711_v44 = vld [vmem:[#allocation7 + $0x24] sm:$0xf] }
  0x29   :  { %342 = vmatpush.bf16.msra.mxu2 %v624_v22  ;;  %355 = vmatpush.bf16.msra.mxu3 %v628_v23  ;;  %v593_v45 = vld [vmem:[#allocation7 + $0x28] sm:$0xf0]  ;;  %v592_v46 = vor.u32 %v712_v43, %v591_v42  ;;  %v752_v48 = vld [vmem:[#allocation2] ss:$0 sm:$0xff]  ;;  %v583_v54 = vld [vmem:[#allocation7 + $0x10] sm:$0xf] }
  0x2a   :  { %230 = vmatpush.bf16.msra.mxu1 %v704_v10  ;;  %v596_v47 = vor.u32 %v711_v44, %v593_v45  ;;  %v710_v55 = vld [vmem:[#allocation7 + $0x14] sm:$0xf0]  ;;  %v709_v56 = vld [vmem:[#allocation7 + $0x14] sm:$0xf]  ;;  %v585_v58 = vld [vmem:[#allocation7 + $0x18] sm:$0xf0] }
  0x2b   :  { %v584_v57 = vor.u32 %v710_v55, %v583_v54  ;;  %v588_v59 = vor.u32 %v709_v56, %v585_v58  ;;  %v575_v60 = vld [vmem:[#allocation7] sm:$0xf]  ;;  %v708_v61 = vld [vmem:[#allocation7 + $0x4] sm:$0xf0]  ;;  %v707_v62 = vld [vmem:[#allocation7 + $0x4] sm:$0xf] }
  0x2c   :  { %v576_v63 = vor.u32 %v708_v61, %v575_v60  ;;  %v577_v0 = vld [vmem:[#allocation7 + $0x8] sm:$0xf0]  ;;  %v730_v2 = vld [vmem:[#allocation10 + $0x38] sm:$0xff]  ;;  %v729_v4 = vld [vmem:[#allocation10 + $0x30] sm:$0xff] }
  0x2d   :  { %343 = vmatpush.bf16.msra.mxu2 %v616_v28  ;;  %356 = vmatpush.bf16.msra.mxu3 %v620_v29  ;;  %v580_v1 = vor.u32 %v707_v62, %v577_v0  ;;  %v738_v3 = vld [vmem:[#allocation10 + $0x78] sm:$0xff]  ;;  %v737_v5 = vld [vmem:[#allocation10 + $0x70] sm:$0xff]  ;;  %v728_v6 = vld [vmem:[#allocation10 + $0x28] sm:$0xff] }
  0x2e   :  { %231 = vmatpush.bf16.msra.mxu1 %v703_v11  ;;  %503 = vmatpush.bf16.msrb.mxu0 %v730_v2  ;;  %v736_v7 = vld [vmem:[#allocation10 + $0x68] sm:$0xff]  ;;  %v727_v8 = vld [vmem:[#allocation10 + $0x20] sm:$0xff]  ;;  %v726_v10 = vld [vmem:[#allocation10 + $0x18] sm:$0xff] }
  0x2f   :  { %v735_v9 = vld [vmem:[#allocation10 + $0x60] sm:$0xff]  ;;  %v734_v11 = vld [vmem:[#allocation10 + $0x58] sm:$0xff]  ;;  %v725_v12 = vld [vmem:[#allocation10 + $0x10] sm:$0xff] }
  0x30   :  { %v733_v13 = vld [vmem:[#allocation10 + $0x50] sm:$0xff]  ;;  %v753_v14 = vld [vmem:[#allocation6] ss:$0 sm:$0xff]  ;;  %v724_v20 = vld [vmem:[#allocation10 + $0x8] sm:$0xff] }
  0x31   :  { %344 = vmatpush.bf16.msra.mxu2 %v608_v34  ;;  %357 = vmatpush.bf16.msra.mxu3 %v612_v35  ;;  %v732_v21 = vld [vmem:[#allocation10 + $0x48] sm:$0xff]  ;;  %v723_v22 = vld [vmem:[#allocation10] sm:$0xff]  ;;  %v255_v24 = vld [vmem:[#allocation9] sm:$0x3] }
  0x32   :  { %516 = vmatpush.bf16.msrb.mxu1 %v738_v3  ;;  %504 = vmatpush.bf16.msrb.mxu0 %v729_v4  ;;  %v731_v23 = vld [vmem:[#allocation10 + $0x40] sm:$0xff]  ;;  %v257_v25 = vperm.slane %v255_v24, 0  ;;  %v258_v26 = vperm.slane %v255_v24, 1 }
  0x33   :  { %v754_v37 = vld [vmem:[#allocation12] ss:$0 sm:$0xff] }
  0x35   :  { %345 = vmatpush.bf16.msra.mxu2 %v600_v40  ;;  %358 = vmatpush.bf16.msra.mxu3 %v604_v41 }
  0x36   :  { %517 = vmatpush.bf16.msrb.mxu1 %v737_v5  ;;  %505 = vmatpush.bf16.msrb.mxu0 %v728_v6 }
  0x39   :  { %346 = vmatpush.bf16.msra.mxu2 %v592_v46  ;;  %359 = vmatpush.bf16.msra.mxu3 %v596_v47 }
  0x3a   :  { %518 = vmatpush.bf16.msrb.mxu1 %v736_v7  ;;  %506 = vmatpush.bf16.msrb.mxu0 %v727_v8 }
  0x3d   :  { %347 = vmatpush.bf16.msra.mxu2 %v584_v57  ;;  %360 = vmatpush.bf16.msra.mxu3 %v588_v59 }
  0x3e   :  { %519 = vmatpush.bf16.msrb.mxu1 %v735_v9  ;;  %507 = vmatpush.bf16.msrb.mxu0 %v726_v10 }
  0x41   :  { %348 = vmatpush.bf16.msra.mxu2 %v576_v63  ;;  %361 = vmatpush.bf16.msra.mxu3 %v580_v1 }
  0x42   :  { %520 = vmatpush.bf16.msrb.mxu1 %v734_v11  ;;  %508 = vmatpush.bf16.msrb.mxu0 %v725_v12 }
  0x46   :  { %521 = vmatpush.bf16.msrb.mxu1 %v733_v13  ;;  %509 = vmatpush.bf16.msrb.mxu0 %v724_v20 }
  0x4a   :  { %522 = vmatpush.bf16.msrb.mxu1 %v732_v21  ;;  %510 = vmatpush.bf16.msrb.mxu0 %v723_v22 }
  0x4e   :  { %523 = vmatpush.bf16.msrb.mxu1 %v731_v23 }
  0xa3   :  { %v178_v49 = vpop.f32.mrf.mxu0 }
  0xa4   :  { %v179_v50 = vadd.f32 %v752_v48, %v178_v49 }
  0xa6   :  { %v182_v51 = vmax.f32 %v179_v50, 0.0 }
  0xa8   :  { %v183_v52 = vpack.c.bf16 %v182_v51, %v182_v51 }
  0xaa   :  { %572 = vmatmul.msk.bf16.vlgmr.msra.gmra.mxu1 %vm220_vm1, %v183_v52 }
  0xab   :  { %v180_v53 = vpop.f32.mrf.mxu0 }
 0x127   :  { %v233_v15 = vpop.f32.mrf.mxu1 }
 0x128   :  { %v234_v16 = vadd.f32 %v753_v14, %v233_v15 }
 0x12a   :  { %v237_v17 = vmax.f32 %v234_v16, 0.0 }
 0x12c   :  { %v238_v18 = vpack.c.bf16 %v237_v17, %v237_v17 }
 0x12e   :  { %349 = vmatmul.bf16.vlgmr.msra.gmra.mxu2 %v238_v18  ;;  %362 = vmatmul.bf16.vlgmr.msra.gmra.mxu3 %v238_v18 }
 0x12f   :  { %v235_v19 = vpop.f32.mrf.mxu1 }
 0x1b1   :  { %v350_v27 = vpop.f32.mrf.mxu2  ;;  %v363_v28 = vpop.f32.mrf.mxu3 }
 0x1b2   :  { %v351_v29 = vadd.f32 %v350_v27, %v257_v25  ;;  %v364_v30 = vadd.f32 %v363_v28, %v258_v26 }
 0x1b4   :  { %v367_v31 = vmax.f32 %v351_v29, 0.0  ;;  %v368_v32 = vmax.f32 %v364_v30, 0.0 }
 0x1b6   :  { %v369_v33 = vpack.c.bf16 %v367_v31, %v367_v31  ;;  %v370_v34 = vpack.c.bf16 %v368_v32, %v368_v32 }
 0x1b8   :  { %511 = vmatmul.bf16.vlgmr.msrb.gmra.mxu0 %v369_v33  ;;  %524 = vmatmul.bf16.vlgmr.msrb.gmra.mxu1 %v370_v34 }
 0x1b9   :  { %v352_v35 = vpop.f32.mrf.mxu2  ;;  %v365_v36 = vpop.f32.mrf.mxu3 }
 0x235   :  { %v512_v38 = vpop.f32.mrf.mxu0  ;;  %v525_v39 = vpop.f32.mrf.mxu1 }
 0x236   :  { %v513_v40 = vadd.f32 %v754_v37, %v512_v38 }
 0x238   :  { %v526_v41 = vadd.f32 %v525_v39, %v513_v40 }
 0x23a   :  { %529 = vmax.xlane.f32.xlu0 %v526_v41 }
 0x23d   :  { %v514_v42 = vpop.f32.mrf.mxu0  ;;  %v527_v43 = vpop.f32.mrf.mxu1 }
 0x2ad   :  { %v530_v44 = vpop.xlane.xlu0 %529 }
 0x2ae   :  { %v531_v45 = vsub.f32 %v526_v41, %v530_v44 }
 0x2b0   :  { %v532_v46 = vmul.f32 1.442695, %v531_v45 }
 0x2b2   :  { %755 = vpow2.f32 %v532_v46 }
 0x2b8   :  { %v756_v47 = vpop.eup %755 }
 0x2b9   :  { %534 = vadd.xlane.f32.xlu0 %v756_v47 }
 0x32c   :  { %v535_v48 = vpop.xlane.xlu0 %534 }
 0x32d   :  { %757 = vrcp.f32 %v535_v48 }
 0x333   :  { %v758_v49 = vpop.eup %757 }
 0x334   :  { %v537_v50 = vmul.f32 %v758_v49, %v756_v47 }
 0x336   :  { %538 = vst [vmem:[%s1050_s10] sm:$0xff] %v537_v50 }
 0x337   :  { %543 = vsyncpa [#allocation3], 1 }
 0x338   :  { %544 = vsyncpa [#allocation5], 1 }
 0x339   :  { %545 = vsyncpa [#allocation8], 1 }
 0x33a   :  { %546 = vsyncpa [#allocation11], 1 }

</bundles_post_ra>
